<compile_context>
chip_gen: v7x
topology: tpu7x:2x2x1
jax: 0.10.0
libtpu: 0.0.40
codegen_flags: <defaults>
</compile_context>

<pallas_src>
import functools

import jax
import jax.numpy as jnp
from jax.experimental import pallas as pl
from jax.experimental.pallas import tpu as pltpu

IN_DIM = 10
HID_DIM = 15
Y_FDIM = 20

TILE_B = 8192  # rows per grid step; sweep 4096-16384 per chip (bias high on v7x)


def net2_kernel(x_ref, w1_ref, b1_ref, w2_ref, b2_ref, o_ref):
    # x_ref: (tile_b, 10) f32, row-major straight from HBM.
    # Transpose on the XLU so batch lands on the lane axis (batch-on-lanes orientation
    # needs ~tile_b/256 MXU pushes per layer instead of ~tile_b/8), cast to bf16 for the
    # MXU, accumulate in f32.
    xt = x_ref[...].T.astype(jnp.bfloat16)                       # (10, tile_b)

    h = jnp.dot(w1_ref[...], xt, preferred_element_type=jnp.float32) + b1_ref[...]
    h = jnp.maximum(h, 0.2 * h)                                  # LeakyReLU(0.2)

    y = jnp.dot(w2_ref[...], h.astype(jnp.bfloat16),
                preferred_element_type=jnp.float32) + b2_ref[...]

    # Transpose only the small (20, tile_b) result tile back to row-major before the
    # store so the caller gets (B, 20) directly (no wrapper-side output transpose pass).
    o_ref[...] = y.T.astype(o_ref.dtype)                         # (tile_b, 20)


def _round_up(n, m):
    return ((n + m - 1) // m) * m


@functools.partial(jax.jit, static_argnames=("tile_b", "out_dtype"))
def net2_forward(x, w1, b1, w2, b2, tile_b=TILE_B, out_dtype=jnp.float32):
    """x: (B, 10) f32; w1: (15, 10); b1: (15,); w2: (20, 15); b2: (20,). Returns (B, 20)."""
    B = x.shape[0]

    # Pick the batch tile:
    #  * never (much) larger than B, and a multiple of 8 (sublane constraint),
    #  * >= 2 grid steps for big batches so the "parallel" axis uses both v7x TCs.
    tb = tile_b
    if B >= 2 * 2048:
        tb = min(tb, _round_up(pl.cdiv(B, 2), 128))
    tb = max(8, min(_round_up(tb, 8), _round_up(B, 8)))
    grid_b = pl.cdiv(B, tb)

    w1b = w1.astype(jnp.bfloat16)                        # (15, 10)
    w2b = w2.astype(jnp.bfloat16)                        # (20, 15)
    b1c = b1.reshape(HID_DIM, 1).astype(jnp.float32)     # broadcast over lanes
    b2c = b2.reshape(Y_FDIM, 1).astype(jnp.float32)

    out_bytes = jnp.dtype(out_dtype).itemsize
    flops = 2 * B * (IN_DIM * HID_DIM + HID_DIM * Y_FDIM)
    bytes_accessed = (B * IN_DIM * 4                               # x f32 in (row-major)
                      + B * Y_FDIM * out_bytes                     # y out
                      + (IN_DIM * HID_DIM + HID_DIM * Y_FDIM) * 2  # weights bf16
                      + (HID_DIM + Y_FDIM) * 4)                    # biases f32

    def const_spec(shape):
        # Weights / biases: one tiny block, same index every step -> VMEM-resident.
        return pl.BlockSpec(shape, lambda i: (0,) * len(shape))

    return pl.pallas_call(
        net2_kernel,
        out_shape=jax.ShapeDtypeStruct((B, Y_FDIM), out_dtype),
        grid_spec=pltpu.PrefetchScalarGridSpec(
            num_scalar_prefetch=0,
            grid=(grid_b,),
            in_specs=[
                pl.BlockSpec((tb, IN_DIM), lambda i: (i, 0)),   # x tile, row-major
                const_spec(w1b.shape),
                const_spec(b1c.shape),
                const_spec(w2b.shape),
                const_spec(b2c.shape),
            ],
            out_specs=pl.BlockSpec((tb, Y_FDIM), lambda i: (i, 0)),
        ),
        compiler_params=pltpu.CompilerParams(
            dimension_semantics=("parallel",),
        ),
        cost_estimate=pl.CostEstimate(
            flops=flops, transcendentals=0, bytes_accessed=bytes_accessed),
    )(x, w1b, b1c, w2b, b2c)


def init_params(key):
    # PyTorch nn.Linear layout: W (out_features, in_features), b (out_features,),
    # default init U(-1/sqrt(fan_in), 1/sqrt(fan_in)).
    k1, k2, k3, k4 = jax.random.split(key, 4)
    lim1 = 1.0 / jnp.sqrt(jnp.float32(IN_DIM))
    lim2 = 1.0 / jnp.sqrt(jnp.float32(HID_DIM))
    w1 = jax.random.uniform(k1, (HID_DIM, IN_DIM), jnp.float32, -lim1, lim1)
    b1 = jax.random.uniform(k2, (HID_DIM,), jnp.float32, -lim1, lim1)
    w2 = jax.random.uniform(k3, (Y_FDIM, HID_DIM), jnp.float32, -lim2, lim2)
    b2 = jax.random.uniform(k4, (Y_FDIM,), jnp.float32, -lim2, lim2)
    return w1, b1, w2, b2


if __name__ == "__main__":
    key = jax.random.PRNGKey(0)
    kx, kp = jax.random.split(key)
    w1, b1, w2, b2 = init_params(kp)

    def ref_fwd(x):
        # Exact f32 PyTorch semantics (the kernel quantizes weights/activations to bf16
        # for the MXU, so compare with a quantization-sized tolerance).
        h = x @ w1.T + b1[None, :]
        h = jnp.where(h >= 0, h, 0.2 * h)
        return h @ w2.T + b2[None, :]

    # Small, deterministic checks:
    #   (B=96, tile_b=32)  -> 3-step pipelined batch grid, exact blocks.
    #   (B=100, tile_b big) -> single partial (padded) last block, masked output writes.
    for B, tb in ((96, 32), (100, TILE_B)):
        x = jax.random.normal(jax.random.fold_in(kx, B), (B, IN_DIM), jnp.float32)
        out = jax.block_until_ready(net2_forward(x, w1, b1, w2, b2, tile_b=tb))
        ref = ref_fwd(x)
        assert out.shape == (B, Y_FDIM)
        err = float(jnp.max(jnp.abs(out - ref)))
        assert err < 5e-2, err

    print("KERNEL_OK")
</pallas_src>

<mosaic_0001>
module attributes {stable_mosaic.version = 11 : i64} {
  func.func @net2_kernel(%arg0: i32, %arg1: memref<32x10xf32, #tpu.memory_space<vmem>>, %arg2: memref<15x10xbf16, #tpu.memory_space<vmem>>, %arg3: memref<15x1xf32, #tpu.memory_space<vmem>>, %arg4: memref<20x15xbf16, #tpu.memory_space<vmem>>, %arg5: memref<20x1xf32, #tpu.memory_space<vmem>>, %arg6: memref<32x20xf32, #tpu.memory_space<vmem>>) attributes {dimension_semantics = [#tpu.dimension_semantics<parallel>], iteration_bounds = array<i64: 3>, scalar_prefetch = 0 : i64, scratch_operands = 0 : i64, tpu.core_type = #tpu.core_type<tc>, window_params = [{transform_indices = @transform_0, window_bounds = array<i64: 32, 10>}, {pipeline_mode = #tpu.pipeline_mode<synchronous>, transform_indices = @transform_1, window_bounds = array<i64: 15, 10>}, {pipeline_mode = #tpu.pipeline_mode<synchronous>, transform_indices = @transform_2, window_bounds = array<i64: 15, 1>}, {pipeline_mode = #tpu.pipeline_mode<synchronous>, transform_indices = @transform_3, window_bounds = array<i64: 20, 15>}, {pipeline_mode = #tpu.pipeline_mode<synchronous>, transform_indices = @transform_4, window_bounds = array<i64: 20, 1>}, {transform_indices = @transform_5, window_bounds = array<i64: 32, 20>}]} {
    %c0 = arith.constant 0 : index
    %c0_0 = arith.constant 0 : index
    %0 = vector.load %arg1[%c0, %c0_0] : memref<32x10xf32, #tpu.memory_space<vmem>>, vector<32x10xf32>
    %1 = tpu.transpose %0, [1, 0] : vector<32x10xf32> -> vector<10x32xf32>
    %2 = arith.truncf %1 : vector<10x32xf32> to vector<10x32xbf16>
    %c0_1 = arith.constant 0 : index
    %c0_2 = arith.constant 0 : index
    %3 = vector.load %arg2[%c0_1, %c0_2] : memref<15x10xbf16, #tpu.memory_space<vmem>>, vector<15x10xbf16>
    %cst = arith.constant dense<0.000000e+00> : vector<15x32xf32>
    %4 = tpu.matmul %3, %2, %cst {dimension_numbers = #tpu.dot_dimension_numbers<[1], [0], [0], [1], [0, 0, 1, 1], [], []>} : vector<15x10xbf16>, vector<10x32xbf16>, vector<15x32xf32> -> vector<15x32xf32>
    %c0_3 = arith.constant 0 : index
    %c0_4 = arith.constant 0 : index
    %5 = vector.load %arg3[%c0_3, %c0_4] : memref<15x1xf32, #tpu.memory_space<vmem>>, vector<15x1xf32>
    %6 = vector.broadcast %5 : vector<15x1xf32> to vector<15x32xf32>
    %7 = arith.addf %4, %6 : vector<15x32xf32>
    %cst_5 = arith.constant 2.000000e-01 : f32
    %8 = vector.broadcast %cst_5 : f32 to vector<15x32xf32>
    %9 = arith.mulf %8, %7 : vector<15x32xf32>
    %10 = arith.maximumf %7, %9 : vector<15x32xf32>
    %c0_6 = arith.constant 0 : index
    %c0_7 = arith.constant 0 : index
    %11 = vector.load %arg4[%c0_6, %c0_7] : memref<20x15xbf16, #tpu.memory_space<vmem>>, vector<20x15xbf16>
    %12 = arith.truncf %10 : vector<15x32xf32> to vector<15x32xbf16>
    %cst_8 = arith.constant dense<0.000000e+00> : vector<20x32xf32>
    %13 = tpu.matmul %11, %12, %cst_8 {dimension_numbers = #tpu.dot_dimension_numbers<[1], [0], [0], [1], [0, 0, 1, 1], [], []>} : vector<20x15xbf16>, vector<15x32xbf16>, vector<20x32xf32> -> vector<20x32xf32>
    %c0_9 = arith.constant 0 : index
    %c0_10 = arith.constant 0 : index
    %14 = vector.load %arg5[%c0_9, %c0_10] : memref<20x1xf32, #tpu.memory_space<vmem>>, vector<20x1xf32>
    %15 = vector.broadcast %14 : vector<20x1xf32> to vector<20x32xf32>
    %16 = arith.addf %13, %15 : vector<20x32xf32>
    %17 = tpu.transpose %16, [1, 0] : vector<20x32xf32> -> vector<32x20xf32>
    %c0_11 = arith.constant 0 : index
    %c0_12 = arith.constant 0 : index
    %18 = vector.load %arg6[%c0_11, %c0_12] : memref<32x20xf32, #tpu.memory_space<vmem>>, vector<32x20xf32>
    tpu.vector_store %arg6[%c0_11, %c0_12], %17 {strides = array<i32>} : memref<32x20xf32, #tpu.memory_space<vmem>>, vector<32x20xf32>,
    return
  }
  func.func @transform_0(%arg0: i32) -> (i32, i32) {
    %c0_i32 = arith.constant 0 : i32
    %c0_i32_0 = arith.constant 0 : i32
    return %arg0, %c0_i32 : i32, i32
  }
  func.func @transform_1(%arg0: i32) -> (i32, i32) {
    %c0_i32 = arith.constant 0 : i32
    %c0_i32_0 = arith.constant 0 : i32
    %c0_i32_1 = arith.constant 0 : i32
    return %c0_i32, %c0_i32_0 : i32, i32
  }
  func.func @transform_2(%arg0: i32) -> (i32, i32) {
    %c0_i32 = arith.constant 0 : i32
    %c0_i32_0 = arith.constant 0 : i32
    %c0_i32_1 = arith.constant 0 : i32
    return %c0_i32, %c0_i32_0 : i32, i32
  }
  func.func @transform_3(%arg0: i32) -> (i32, i32) {
    %c0_i32 = arith.constant 0 : i32
    %c0_i32_0 = arith.constant 0 : i32
    %c0_i32_1 = arith.constant 0 : i32
    return %c0_i32, %c0_i32_0 : i32, i32
  }
  func.func @transform_4(%arg0: i32) -> (i32, i32) {
    %c0_i32 = arith.constant 0 : i32
    %c0_i32_0 = arith.constant 0 : i32
    %c0_i32_1 = arith.constant 0 : i32
    return %c0_i32, %c0_i32_0 : i32, i32
  }
  func.func @transform_5(%arg0: i32) -> (i32, i32) {
    %c0_i32 = arith.constant 0 : i32
    %c0_i32_0 = arith.constant 0 : i32
    return %arg0, %c0_i32 : i32, i32
  }
}

</mosaic_0001>

<bundles_post_ra>
// kernel: net2_forward.1
= control target key start
LH: loop header
LB: loop body
LE: loop exit
PB: predicated region body
PF: predicated region fallthrough
CT: control target
= control target key end

     0   :  { %s616_s18 = smov 0   ;;  %s666_s0 = inlined_call_operand.vmem [shape: f32[96,10], index: 0, kind: input, shape index: {}]   ;;  %s667_s1 = inlined_call_operand.vmem [shape: bf16[15,10], index: 1, kind: input, shape index: {}]   ;;  %s668_s2 = inlined_call_operand.vmem [shape: f32[15,1], index: 2, kind: input, shape index: {}]   ;;  %s669_s3 = inlined_call_operand.vmem [shape: bf16[20,15], index: 3, kind: input, shape index: {}]   ;;  %s670_s4 = inlined_call_operand.vmem [shape: f32[20,1], index: 4, kind: input, shape index: {}]   ;;  %s671_s5 = inlined_call_operand.vmem [shape: f32[96,20], index: 5, kind: output, shape index: {}]  }
   0x1 LB: > { %s523_s19 = sadd.s32 4294967295, %s580_s18   ;;  %p527_p0 = scmp.ge.s32.totalorder %s580_s18, 1  ;;  %s580_s18 = sphi %s616_s18, %s15_s18  }
   0x2   : > { %p188_p1 = scmp.lt.s32.totalorder %s580_s18, 4 }
   0x4   : > { %p189_p2 = pnand %p527_p0, %p188_p1 }
   0x5   : > { %s528_s20 = sshll.u32 (!%p189_p2), %s523_s19, 2  ;;  %v582_v3 = vmov (!%p189_p2), 0.0   ;;  %vm583_vm0 = vmmov (!%p189_p2), 0   ;;  %v268_v5 = vld [vmem:[%s668_s2] sm:$0xff] (!%p189_p2)  ;;  %v584_v6 = vmov (!%p189_p2), 0   ;;  %v343_v9 = vld [vmem:[%s670_s4 + $0x8] sm:$0xff] (!%p189_p2) }
   0x6   : > { %192 = sbr.rel (%p189_p2) target bundleno = 741 (0x2e5), region = 40  ;;  %p217_p3 = scmp.lt.s32.totalorder (!%p189_p2), %s528_s20, 11  ;;  %545 = vmatprep.subr.bf16.mxu0 (!%p189_p2), %v582_v3  ;;  %547 = vmatprep.mubr.msk.bf16.mxu0 (!%p189_p2), %vm583_vm0, %v582_v3  ;;  %v269_v7 = vld [vmem:[%s668_s2 + $0x8] sm:$0x7f] (!%p189_p2)  ;;  %v342_v8 = vld [vmem:[%s670_s4] sm:$0xff] (!%p189_p2)  ;;  %vm289_vm1 = vcmask (!%p189_p2), 1044480  }
   0x7   : > { %569 = vset.pattern.permute.xlu1 (!%p189_p2), %v584_v6  ;;  %v571_v14 = vld [vmem:[%s667_s1] sm:$0xff] (!%p189_p2)   ;;  %vm285_vm2 = vcmask (!%p189_p2), 80896   ;;  %vm368_vm3 = vcmask (!%p189_p2), 121856   ;;  %v344_v16 = vld [vmem:[%s670_s4 + $0x10] sm:$0xf] (!%p189_p2)  ;;  %vm375_vm4 = vcmask (!%p189_p2), 1046528  }
   0x8   : > { %272 = vperm.xlu1 (!%p189_p2), %569, %v268_v5   ;;  %v572_v15 = vld [vmem:[%s669_s3] sm:$0xff] (!%p189_p2)   ;;  %vm376_vm5 = vcmask (!%p189_p2), 1047552   ;;  %v585_v27 = vmov (!%p189_p2), 65535   ;;  %v573_v34 = vld [vmem:[%s669_s3 + $0x8] ss:$0 sps:$4 sm:$0x33] (!%p189_p2)  }
   0x9   : > { %553 = vmatprep.mubr.msk.bf16.mxu1 (!%p189_p2), %vm368_vm3, %v572_v15  ;;  %v377_v28 = vsel (!%p189_p2), %vm375_vm4, 4294967295, %v585_v27  ;;  %vm462_vm6 = vcmask (!%p189_p2), 162816  }
   0xa   : > { %v378_v31 = vsel (!%p189_p2), %vm376_vm5, %v377_v28, 0 }
   0xc   : > { %277 = vperm.xlu1 (!%p189_p2), %569, %v269_v7  }
   0xd   : > { %s673_s20 = smov (!%p217_p3, %s528_s20), 11 }
   0xe   : > { %s529_s21 = sshll.u32 %s673_s20, 3 }
   0xf   : > { %s220_s24 = scalar_lea.vmem %s666_s0, %s529_s21  ;;  %s226_s19 = scalar_lea.vmem %s671_s5, %s529_s21 }
  0x10   : > { %v229_v0 = vld [vmem:[%s220_s24] sm:$0xff]  ;;  %v230_v1 = vld [vmem:[%s220_s24 + $0x8] sm:$0xff]  ;;  %v231_v2 = vld [vmem:[%s220_s24 + $0x10] sm:$0xff]  ;;  %347 = vperm.xlu1 %569, %v342_v8  }
  0x11   : > { %233 = vxpose.xlu0.b32.start [1/4] (short) (narrow) %v229_v0, 16  ;;  %v232_v4 = vld [vmem:[%s220_s24 + $0x18] sm:$0xff] }
  0x14   : > { %352 = vperm.xlu1 %569, %v343_v9  }
  0x15   : > { %234 = vxpose.xlu0.b32.cont [2/4] (short) (narrow) %v230_v1, 16 }
  0x19   : > { %235 = vxpose.xlu0.b32.cont [3/4] (short) (narrow) %v231_v2, 16 }
  0x1d   : > { %236 = vxpose.xlu0.b32.end [4/4] (short) (narrow) %v232_v4, 16 }
  0x46   : > { %570 = vset.pattern.permute.xlu0 %v584_v6 }
  0x47   : > { %357 = vperm.xlu0 %570, %v344_v16  }
  0x87   : > { %v273_v17 = vpop.permute.xlu1 %272 }
  0x8b   : > { %v278_v21 = vpop.permute.xlu1 %277 }
  0x8f   : > { %v348_v35 = vpop.permute.xlu1 %347 }
  0x91   : > { %v249_v10 = vpop.trf.xlu0 }
  0x93   : > { %v353_v41 = vpop.permute.xlu1 %352 }
  0x95   : > { %v250_v11 = vpop.trf.xlu0 }
  0x96   : > { %v265_v12 = vpack.c.bf16 %v250_v11, %v249_v10 }
  0x98   : > { %v291_v13 = vsel %vm289_vm1, %v265_v12, 0 }
  0x99   : > { %546 = vmatpush3.bf16.msra.mxu0 %v291_v13 }
  0x9c   : > { %548 = vmatmul.mubr.msk.bf16.vlgmr.msra.gmra.mrb[0].mxu0 %vm285_vm2, %v571_v14 }
  0xc6   : > { %v358_v43 = vpop.permute.xlu0 %357 }
 0x16f   : > { %v327_v18 = vpop.f32.mrb[0].mxu0 }
 0x170   : > { %v328_v19 = vadd.f32 %v327_v18, %v273_v17  ;;  %v549_v20 = vpop.f32.mrb[1].mxu0 }
 0x171   : > { %v330_v22 = vpop.f32.mrb[2].mxu0 }
 0x172   : > { %v334_v23 = vmul.f32 0.2, %v328_v19  ;;  %v331_v24 = vadd.f32 %v330_v22, %v278_v21  ;;  %v550_v25 = vpop.f32.mrb[3].mxu0 }
 0x174   : > { %v335_v26 = vmul.f32 0.2, %v331_v24  ;;  %v336_v29 = vmax.f32 %v328_v19, %v334_v23 }
 0x176   : > { %v337_v30 = vmax.f32 %v331_v24, %v335_v26 }
 0x178   : > { %v341_v32 = vpack.c.bf16 %v337_v30, %v336_v29 }
 0x17a   : > { %v380_v33 = vand.u32 %v378_v31, %v341_v32 }
 0x17c   : > { %551 = vmatprep.subr.bf16.mxu1 %v380_v33 }
 0x17d   : > { %552 = vmatpush3.bf16.msra.mxu1 %v380_v33 }
 0x180   : > { %554 = vmatmul.mubr.msk.bf16.vlgmr.msra.gmra.mrb[0].mxu1 %vm368_vm3, %v573_v34 }
 0x253   : > { %v555_v36 = vpop.f32.mrb[0].mxu1 }
 0x254   : > { %v416_v37 = vpop.f32.mrb[1].mxu1  ;;  %v425_v44 = vadd.f32 %v555_v36, %v358_v43 }
 0x255   : > { %v417_v38 = vadd.f32 %v416_v37, %v348_v35  ;;  %v556_v39 = vpop.f32.mrb[2].mxu1 }
 0x256   : > { %v419_v40 = vpop.f32.mrb[3].mxu1 }
 0x257   : > { %430 = vxpose.xlu1.b32.start [1/3] (short) (narrow) %v417_v38, 32  ;;  %v420_v42 = vadd.f32 %v419_v40, %v353_v41 }
 0x25b   : > { %431 = vxpose.xlu1.b32.cont [2/3] (short) (narrow) %v420_v42, 32 }
 0x25f   : > { %432 = vxpose.xlu1.b32.end [3/3] (short) (narrow) %v425_v44, 32 }
 0x2d7   : > { %v446_v45 = vpop.trf.xlu1 }
 0x2d8   : > { %463 = vst.msk [vmem:[%s226_s19] sm:$0xff] %vm462_vm6, %v446_v45 }
 0x2db   : > { %v447_v46 = vpop.trf.xlu1 }
 0x2dc   : > { %464 = vst.msk [vmem:[%s226_s19 + $0x8] sm:$0xff] %vm462_vm6, %v447_v46 }
 0x2df   : > { %v448_v47 = vpop.trf.xlu1 }
 0x2e0   : > { %465 = vst.msk [vmem:[%s226_s19 + $0x10] sm:$0xff] %vm462_vm6, %v448_v47 }
 0x2e3   : > { %v449_v48 = vpop.trf.xlu1 }
 0x2e4   : > { %466 = vst.msk [vmem:[%s226_s19 + $0x18] sm:$0xff] %vm462_vm6, %v449_v48 }
 0x2e5 PF: > { %s15_s18 = sadd.s32 1, %s580_s18  }
 0x2e6   : > { %p12_p4 = scmp.ge.s32.totalorder %s15_s18, 5  }
 0x2e8   :  { %14 = sbr.rel (!%p12_p4) target bundleno = 1 (0x1), region = 70 }

</bundles_post_ra>
